<compile_context>
chip_gen: v6e
topology: v6e:2x2x1
jax: 0.10.0
libtpu: 0.0.40
codegen_flags: <defaults>
</compile_context>

<pallas_src>
import functools

import jax
import jax.numpy as jnp
from jax import lax
from jax.experimental import pallas as pl
from jax.experimental.pallas import tpu as pltpu

_LANES = 128  # lane width; top-k side outputs padded to this -> lane-dense stores


def _encode_topk_kernel(topk, compute_dtype,
                        x_ref, bias_ref, w_enc_ref, b_enc_ref,   # inputs
                        val_ref, idx_ref,                        # outputs
                        wbuf, gbuf):                             # scratch
  """Grid (nb, nf): encode one (TB, TF) tile, merge into running top-k."""
  j = pl.program_id(1)
  nf = pl.num_programs(1)
  tb = x_ref.shape[0]
  tf = w_enc_ref.shape[0]
  neg_inf = jnp.float32(-jnp.inf)
  int_max = jnp.int32(jnp.iinfo(jnp.int32).max)

  @pl.when(j == 0)
  def _():
    # candidate region: values -inf, indices 0
    wbuf[:, :_LANES] = jnp.full((tb, _LANES), neg_inf, jnp.float32)
    gbuf[:, :_LANES] = jnp.zeros((tb, _LANES), jnp.int32)

  # encode tile: (x - bias) @ W_enc_tile^T + b_enc_tile.
  # dot_general contracts E directly from the stored (TF, E) layout -> no .T.
  xb = x_ref[...] - bias_ref[...]                                  # (TB, E) f32
  enc = lax.dot_general(
      xb.astype(compute_dtype), w_enc_ref[...],
      dimension_numbers=(((1,), (1,)), ((), ())),
      preferred_element_type=jnp.float32) + b_enc_ref[...]         # (TB, TF) f32

  # assemble [old candidates | new tile] (values + global feature indices)
  wbuf[:, _LANES:] = enc
  gbuf[:, _LANES:] = j * tf + lax.broadcasted_iota(jnp.int32, (tb, tf), 1)
  work0 = wbuf[...]
  gidx = gbuf[...]
  kcol = lax.broadcasted_iota(jnp.int32, (tb, _LANES), 1)

  def select(t, carry):
    work, new_val, new_idx = carry
    m = jnp.max(work, axis=-1, keepdims=True)                      # XLU reduce 1
    is_max = work == m
    g = jnp.min(jnp.where(is_max, gidx, int_max),
                axis=-1, keepdims=True)                            # XLU reduce 2
    sel = is_max & (gidx == g)                 # tie-break: lowest feature index
    work = jnp.where(sel, neg_inf, work)
    lane_t = kcol == t
    new_val = jnp.where(lane_t, m, new_val)    # build results in registers;
    new_idx = jnp.where(lane_t, g, new_idx)    # single lane-dense store at end
    return work, new_val, new_idx

  init = (work0,
          jnp.full((tb, _LANES), neg_inf, jnp.float32),
          jnp.zeros((tb, _LANES), jnp.int32))
  _, new_val, new_idx = lax.fori_loop(0, topk, select, init,
                                      unroll=(topk <= 8))

  # persist merged top-k candidates for the next F tile
  wbuf[:, :_LANES] = new_val
  gbuf[:, :_LANES] = new_idx

  @pl.when(j == nf - 1)
  def _():
    val_ref[...] = new_val      # one lane-dense (TB, 128) store per batch tile
    idx_ref[...] = new_idx


def _decode_mse_kernel(topk, compute_dtype,
                       val_ref, idx_ref, x_ref, bias_ref, b_dec_ref, w_dec_ref,
                       enc_ref, dec_ref, sse_ref):
  """Grid (nb, nf): rebuild masked code tile, accumulate decode over F tiles
  directly in the resident (TB, E) output block, finalize decoded + per-row SSE
  on the last tile."""
  j = pl.program_id(1)
  nf = pl.num_programs(1)
  tb, tf = enc_ref.shape

  vals = val_ref[...]                                              # (TB, 128) f32
  idxs = idx_ref[...]                                              # (TB, 128) i32
  fidx = j * tf + lax.broadcasted_iota(jnp.int32, (tb, tf), 1)

  # masked 'encoded' tile: top-k value at selected features, 0 elsewhere.
  # k is small & static; static width-1 slices keep everything register-resident.
  enc_m = jnp.zeros((tb, tf), jnp.float32)
  for t in range(topk):
    enc_m = jnp.where(fidx == idxs[:, t:t + 1], vals[:, t:t + 1], enc_m)
  enc_ref[...] = enc_m

  # decode partial: enc_m_tile @ W_dec[:, tile]^T  (contract TF, no .T, bf16 MXU)
  partial = lax.dot_general(
      enc_m.astype(compute_dtype), w_dec_ref[...],
      dimension_numbers=(((1,), (1,)), ((), ())),
      preferred_element_type=jnp.float32)

  @pl.when(j == 0)
  def _():
    dec_ref[...] = partial            # first tile writes, no zero-init pass

  @pl.when(j > 0)
  def _():
    dec_ref[...] += partial           # output block is resident across F tiles

  @pl.when(j == nf - 1)
  def _():
    xb = x_ref[...] - bias_ref[...]
    dec = dec_ref[...] + b_dec_ref[...] + bias_ref[...]
    dec_ref[...] = dec
    err = xb - dec                          # matches torch: mse(x - bias, decoded)
    sse = jnp.sum(err * err, axis=-1, keepdims=True)               # (TB, 1)
    sse_ref[...] = jnp.broadcast_to(sse, sse_ref.shape)            # lane-dense


def _pick_block(n, candidates):
  for c in candidates:
    if c <= n and n % c == 0:
      return c
  return n


def topk_sae_forward(x, w_enc, b_enc, w_dec, b_dec, bias, topk,
                     return_r2=False, block_b=None, block_f=None,
                     compute_dtype=jnp.bfloat16,
                     vmem_limit_bytes=48 * 1024 * 1024):
  """Forward pass matching TopKSparseAutoencoder.forward."""
  x = jnp.asarray(x, jnp.float32)
  B, E = x.shape
  F = w_enc.shape[0]
  assert w_enc.shape == (F, E) and w_dec.shape == (E, F)
  assert 0 < topk <= min(F, _LANES), "topk must be <= min(n_features, 128)"

  # Tile sizes: biggest divisors that keep the double-buffered working set well
  # under v7x's 64 MiB VMEM.  Larger block_b amortizes weight streaming across
  # batch tiles (W_enc/W_dec are re-streamed once per batch tile), but the x tile
  # and the top-k work arrays scale with block_b, so cap it by E.
  if block_b is None:
    max_bb = 512 if E <= 1024 else (256 if E <= 4096 else 128)
    block_b = _pick_block(
        B, tuple(c for c in (512, 256, 128, 64, 32, 16, 8) if c <= max_bb))
  if block_f is None:
    block_f = _pick_block(F, (512, 256, 128))
  assert B % block_b == 0 and F % block_f == 0
  nb, nf = B // block_b, F // block_f

  # bf16 matmul operands (halves weight HBM traffic); everything else f32.
  # (Weights are tied at init, w_dec == w_enc.T; we keep them separate to match
  #  nn.Linear generality after training.)
  w_enc_c = jnp.asarray(w_enc, compute_dtype)
  w_dec_c = jnp.asarray(w_dec, compute_dtype)
  b_enc2 = jnp.asarray(b_enc, jnp.float32).reshape(1, F)
  b_dec2 = jnp.asarray(b_dec, jnp.float32).reshape(1, E)
  bias2 = jnp.asarray(bias, jnp.float32).reshape(1, E)

  cparams = pltpu.CompilerParams(
      dimension_semantics=("parallel", "arbitrary"),
      vmem_limit_bytes=vmem_limit_bytes)

  # ---- kernel 1: encode + streaming top-k over F tiles ----
  vals_p, idxs_p = pl.pallas_call(
      functools.partial(_encode_topk_kernel, topk, compute_dtype),
      out_shape=(jax.ShapeDtypeStruct((B, _LANES), jnp.float32),
                 jax.ShapeDtypeStruct((B, _LANES), jnp.int32)),
      grid_spec=pltpu.PrefetchScalarGridSpec(
          num_scalar_prefetch=0,
          grid=(nb, nf),
          in_specs=[
              pl.BlockSpec((block_b, E), lambda i, j: (i, 0)),       # x
              pl.BlockSpec((1, E), lambda i, j: (0, 0)),             # bias
              pl.BlockSpec((block_f, E), lambda i, j: (j, 0)),       # W_enc tile
              pl.BlockSpec((1, block_f), lambda i, j: (0, j)),       # b_enc tile
          ],
          out_specs=(
              pl.BlockSpec((block_b, _LANES), lambda i, j: (i, 0)),  # values
              pl.BlockSpec((block_b, _LANES), lambda i, j: (i, 0)),  # indices
          ),
          scratch_shapes=[
              pltpu.VMEM((block_b, _LANES + block_f), jnp.float32),  # [cand|tile] vals
              pltpu.VMEM((block_b, _LANES + block_f), jnp.int32),    # [cand|tile] idxs
          ]),
      compiler_params=cparams,
  )(x, bias2, w_enc_c, b_enc2)

  # ---- kernel 2: masked code + decode (F-reduction) + per-row SSE ----
  enc_m, dec, sse = pl.pallas_call(
      functools.partial(_decode_mse_kernel, topk, compute_dtype),
      out_shape=(jax.ShapeDtypeStruct((B, F), jnp.float32),
                 jax.ShapeDtypeStruct((B, E), jnp.float32),
                 jax.ShapeDtypeStruct((B, _LANES), jnp.float32)),
      grid_spec=pltpu.PrefetchScalarGridSpec(
          num_scalar_prefetch=0,
          grid=(nb, nf),
          in_specs=[
              pl.BlockSpec((block_b, _LANES), lambda i, j: (i, 0)),  # topk vals
              pl.BlockSpec((block_b, _LANES), lambda i, j: (i, 0)),  # topk idxs
              pl.BlockSpec((block_b, E), lambda i, j: (i, 0)),       # x
              pl.BlockSpec((1, E), lambda i, j: (0, 0)),             # bias
              pl.BlockSpec((1, E), lambda i, j: (0, 0)),             # b_dec
              pl.BlockSpec((E, block_f), lambda i, j: (0, j)),       # W_dec tile
          ],
          out_specs=(
              pl.BlockSpec((block_b, block_f), lambda i, j: (i, j)), # encoded
              pl.BlockSpec((block_b, E), lambda i, j: (i, 0)),       # decoded (acc)
              pl.BlockSpec((block_b, _LANES), lambda i, j: (i, 0)),  # per-row SSE
          )),
      compiler_params=cparams,
  )(vals_p, idxs_p, x, bias2, b_dec2, w_dec_c)

  vals = vals_p[:, :topk]
  idxs = idxs_p[:, :topk]
  inv_n = 1.0 / float(B * E)            # GLOBAL denominator, precomputed reciprocal
  mse = jnp.sum(sse[:, 0]) * inv_n

  out = {
      'encoded': enc_m,
      'decoded': dec,
      'mse': mse,
      'feature_activations': enc_m,
      'topk_idxs': idxs,                # int32 (torch.topk returns int64)
      'topk_values': vals,
      'total_loss': mse,
  }
  if return_r2:
    # r2_per_channel(decoded, x - bias): tiny glue, matches the PyTorch code
    # exactly (including no epsilon in the variance denominator).
    xb = x - bias2
    ch_mean = jnp.mean(xb, axis=-2)
    var = jnp.mean((xb - ch_mean) ** 2, axis=-2)
    err = jnp.mean((dec - xb) ** 2, axis=-2)
    r2 = 1.0 - err / var
    out['r2'] = r2
    out['mean_r2'] = jnp.mean(r2)
  return out


def init_params(key, embedding_size, n_features):
  """Init mirroring the module's __init__ (shapes exact, uniform approx.)."""
  k1, k2, k3, k4 = jax.random.split(key, 4)
  bound_e = 1.0 / jnp.sqrt(jnp.float32(embedding_size))
  bound_f = 1.0 / jnp.sqrt(jnp.float32(n_features))
  w_raw = jax.random.uniform(k1, (n_features, embedding_size),
                             jnp.float32, -bound_e, bound_e)
  direction_lengths = (jax.random.uniform(k2, (n_features, 1), jnp.float32)
                       * 0.95 + 0.05)
  w_enc = (w_raw / jnp.linalg.norm(w_raw, axis=-1, keepdims=True)
           ) * direction_lengths                   # (F, E) encode.weight
  w_dec = w_enc.T                                  # (E, F) decode.weight (tied)
  b_enc = jax.random.uniform(k3, (n_features,), jnp.float32, -bound_e, bound_e)
  b_dec = jax.random.uniform(k4, (embedding_size,), jnp.float32,
                             -bound_f, bound_f)
  bias = jnp.zeros((embedding_size,), jnp.float32)
  return w_enc, b_enc, w_dec, b_dec, bias


if __name__ == "__main__":
  key = jax.random.PRNGKey(0)
  kx, kp, kb = jax.random.split(key, 3)

  batch, embedding_size, n_features, topk = 16, 128, 256, 4
  x = jax.random.normal(kx, (batch, embedding_size), jnp.float32)
  w_enc, b_enc, w_dec, b_dec, bias = init_params(kp, embedding_size, n_features)
  # small non-zero bias so the bias path is exercised
  bias = 0.01 * jax.random.normal(kb, (embedding_size,), jnp.float32)

  # ---- f32-compute run, blocks chosen to exercise both grid axes (2 x 2) ----
  out = topk_sae_forward(x, w_enc, b_enc, w_dec, b_dec, bias, topk,
                         return_r2=True, block_b=8, block_f=128,
                         compute_dtype=jnp.float32)
  jax.block_until_ready(out)

  # shape checks
  assert out['encoded'].shape == (batch, n_features)
  assert out['decoded'].shape == (batch, embedding_size)
  assert out['topk_idxs'].shape == (batch, topk)
  assert out['topk_values'].shape == (batch, topk)
  assert int(jnp.sum(out['encoded'] != 0.0)) <= batch * topk

  # numeric checks (robust to MXU precision / near-tie selection differences)
  xb = x - bias[None, :]
  ref_enc = jnp.dot(xb, w_enc.T, precision=lax.Precision.HIGHEST) + b_enc[None, :]
  gathered = jnp.take_along_axis(ref_enc, out['topk_idxs'], axis=-1)
  assert jnp.allclose(out['topk_values'], gathered, atol=5e-2, rtol=5e-2)
  ref_kth = lax.top_k(ref_enc, topk)[0][:, -1]
  assert bool(jnp.all(out['topk_values'][:, -1] >= ref_kth - 5e-2))
  ref_dec = (jnp.dot(out['encoded'], w_dec.T, precision=lax.Precision.HIGHEST)
             + b_dec[None, :] + bias[None, :])
  assert jnp.allclose(out['decoded'], ref_dec, atol=5e-2, rtol=5e-2)
  ref_mse = jnp.mean((xb - out['decoded']) ** 2)
  assert jnp.allclose(out['mse'], ref_mse, atol=1e-4, rtol=1e-3)

  # ---- default bf16-compute run (auto tile selection) ----
  out_bf16 = topk_sae_forward(x, w_enc, b_enc, w_dec, b_dec, bias, topk)
  jax.block_until_ready(out_bf16)
  assert out_bf16['decoded'].shape == (batch, embedding_size)
  assert int(jnp.sum(out_bf16['encoded'] != 0.0)) <= batch * topk

  print("KERNEL_OK")
</pallas_src>

<mosaic_0001>
module attributes {stable_mosaic.version = 11 : i64} {
  func.func @_encode_topk_kernel(%arg0: i32, %arg1: i32, %arg2: memref<8x128xf32, #tpu.memory_space<vmem>>, %arg3: memref<1x128xf32, #tpu.memory_space<vmem>>, %arg4: memref<128x128xf32, #tpu.memory_space<vmem>>, %arg5: memref<1x128xf32, #tpu.memory_space<vmem>>, %arg6: memref<8x128xf32, #tpu.memory_space<vmem>>, %arg7: memref<8x128xi32, #tpu.memory_space<vmem>>, %arg8: memref<8x256xf32, #tpu.memory_space<vmem>>, %arg9: memref<8x256xi32, #tpu.memory_space<vmem>>) attributes {dimension_semantics = [#tpu.dimension_semantics<parallel>, #tpu.dimension_semantics<arbitrary>], iteration_bounds = array<i64: 2, 2>, scalar_prefetch = 0 : i64, scratch_operands = 2 : i64, tpu.core_type = #tpu.core_type<tc>, window_params = [{transform_indices = @transform_0, window_bounds = array<i64: 8, 128>}, {pipeline_mode = #tpu.pipeline_mode<synchronous>, transform_indices = @transform_1, window_bounds = array<i64: 1, 128>}, {transform_indices = @transform_2, window_bounds = array<i64: 128, 128>}, {transform_indices = @transform_3, window_bounds = array<i64: 1, 128>}, {transform_indices = @transform_4, window_bounds = array<i64: 8, 128>}, {transform_indices = @transform_5, window_bounds = array<i64: 8, 128>}]} {
    %c0_i32 = arith.constant 0 : i32
    %0 = arith.cmpi eq, %arg1, %c0_i32 : i32
    %1 = arith.extui %0 : i1 to i32
    %cst = arith.constant 0xFF800000 : f32
    %c0_i32_0 = arith.constant 0 : i32
    %2 = arith.cmpi ne, %1, %c0_i32_0 : i32
    scf.if %2 {
      %112 = vector.broadcast %cst : f32 to vector<8x128xf32>
      %c0_34 = arith.constant 0 : index
      %c0_35 = arith.constant 0 : index
      %113 = vector.load %arg8[%c0_34, %c0_35] : memref<8x256xf32, #tpu.memory_space<vmem>>, vector<8x128xf32>
      tpu.vector_store %arg8[%c0_34, %c0_35], %112 {strides = array<i32>} : memref<8x256xf32, #tpu.memory_space<vmem>>, vector<8x128xf32>,
      %c0_i32_36 = arith.constant 0 : i32
      %114 = vector.broadcast %c0_i32_36 : i32 to vector<8x128xi32>
      %c0_37 = arith.constant 0 : index
      %c0_38 = arith.constant 0 : index
      %115 = vector.load %arg9[%c0_37, %c0_38] : memref<8x256xi32, #tpu.memory_space<vmem>>, vector<8x128xi32>
      tpu.vector_store %arg9[%c0_37, %c0_38], %114 {strides = array<i32>} : memref<8x256xi32, #tpu.memory_space<vmem>>, vector<8x128xi32>,
    } else {
    }
    %c0 = arith.constant 0 : index
    %c0_1 = arith.constant 0 : index
    %3 = vector.load %arg2[%c0, %c0_1] : memref<8x128xf32, #tpu.memory_space<vmem>>, vector<8x128xf32>
    %c0_2 = arith.constant 0 : index
    %c0_3 = arith.constant 0 : index
    %4 = vector.load %arg3[%c0_2, %c0_3] : memref<1x128xf32, #tpu.memory_space<vmem>>, vector<1x128xf32>
    %5 = vector.broadcast %4 : vector<1x128xf32> to vector<8x128xf32>
    %6 = arith.subf %3, %5 : vector<8x128xf32>
    %c0_4 = arith.constant 0 : index
    %c0_5 = arith.constant 0 : index
    %7 = vector.load %arg4[%c0_4, %c0_5] : memref<128x128xf32, #tpu.memory_space<vmem>>, vector<128x128xf32>
    %cst_6 = arith.constant dense<0.000000e+00> : vector<8x128xf32>
    %8 = tpu.matmul %6, %7, %cst_6 {dimension_numbers = #tpu.dot_dimension_numbers<[1], [1], [0], [0], [0, 0, 1, 0], [], []>} : vector<8x128xf32>, vector<128x128xf32>, vector<8x128xf32> -> vector<8x128xf32>
    %c0_7 = arith.constant 0 : index
    %c0_8 = arith.constant 0 : index
    %9 = vector.load %arg5[%c0_7, %c0_8] : memref<1x128xf32, #tpu.memory_space<vmem>>, vector<1x128xf32>
    %10 = vector.broadcast %9 : vector<1x128xf32> to vector<8x128xf32>
    %11 = arith.addf %8, %10 : vector<8x128xf32>
    %c0_9 = arith.constant 0 : index
    %c128 = arith.constant 128 : index
    %12 = vector.load %arg8[%c0_9, %c128] : memref<8x256xf32, #tpu.memory_space<vmem>>, vector<8x128xf32>
    tpu.vector_store %arg8[%c0_9, %c128], %11 {strides = array<i32>} : memref<8x256xf32, #tpu.memory_space<vmem>>, vector<8x128xf32>,
    %c128_i32 = arith.constant 128 : i32
    %13 = arith.muli %arg1, %c128_i32 : i32
    %14 = tpu.iota {dimensions = array<i32: 1>} : vector<8x128xi32>
    %15 = vector.broadcast %13 : i32 to vector<8x128xi32>
    %16 = arith.addi %15, %14 : vector<8x128xi32>
    %c0_10 = arith.constant 0 : index
    %c128_11 = arith.constant 128 : index
    %17 = vector.load %arg9[%c0_10, %c128_11] : memref<8x256xi32, #tpu.memory_space<vmem>>, vector<8x128xi32>
    tpu.vector_store %arg9[%c0_10, %c128_11], %16 {strides = array<i32>} : memref<8x256xi32, #tpu.memory_space<vmem>>, vector<8x128xi32>,
    %c0_12 = arith.constant 0 : index
    %c0_13 = arith.constant 0 : index
    %18 = vector.load %arg8[%c0_12, %c0_13] : memref<8x256xf32, #tpu.memory_space<vmem>>, vector<8x256xf32>
    %c0_14 = arith.constant 0 : index
    %c0_15 = arith.constant 0 : index
    %19 = vector.load %arg9[%c0_14, %c0_15] : memref<8x256xi32, #tpu.memory_space<vmem>>, vector<8x256xi32>
    %20 = tpu.iota {dimensions = array<i32: 1>} : vector<8x128xi32>
    %cst_16 = arith.constant 0xFF800000 : f32
    %21 = vector.broadcast %cst_16 : f32 to vector<8x128xf32>
    %c0_i32_17 = arith.constant 0 : i32
    %22 = vector.broadcast %c0_i32_17 : i32 to vector<8x128xi32>
    %c2147483647_i32 = arith.constant 2147483647 : i32
    %cst_18 = arith.constant 0xFF800000 : f32
    %c0_i32_19 = arith.constant 0 : i32
    %cst_20 = arith.constant dense<0xFF800000> : vector<8xf32>
    %23 = vector.multi_reduction <maximumf>, %18, %cst_20 [1] : vector<8x256xf32> to vector<8xf32>
    %24 = vector.shape_cast %23 : vector<8xf32> to vector<8x1xf32>
    %25 = vector.broadcast %24 : vector<8x1xf32> to vector<8x256xf32>
    %26 = arith.cmpf oeq, %18, %25 : vector<8x256xf32>
    %27 = vector.broadcast %c2147483647_i32 : i32 to vector<8x256xi32>
    %28 = arith.select %26, %19, %27 : vector<8x256xi1>, vector<8x256xi32>
    %cst_21 = arith.constant dense<2147483647> : vector<8xi32>
    %29 = vector.multi_reduction <minsi>, %28, %cst_21 [1] : vector<8x256xi32> to vector<8xi32>
    %30 = vector.shape_cast %29 : vector<8xi32> to vector<8x1xi32>
    %31 = vector.broadcast %30 : vector<8x1xi32> to vector<8x256xi32>
    %32 = arith.cmpi eq, %19, %31 : vector<8x256xi32>
    %33 = arith.andi %26, %32 : vector<8x256xi1>
    %34 = vector.broadcast %cst_18 : f32 to vector<8x256xf32>
    %35 = arith.select %33, %34, %18 : vector<8x256xi1>, vector<8x256xf32>
    %36 = vector.broadcast %c0_i32_19 : i32 to vector<8x128xi32>
    %37 = arith.cmpi eq, %20, %36 : vector<8x128xi32>
    %38 = vector.shape_cast %24 : vector<8x1xf32> to vector<8x1xf32>
    %39 = vector.broadcast %38 : vector<8x1xf32> to vector<8x128xf32>
    %40 = arith.select %37, %39, %21 : vector<8x128xi1>, vector<8x128xf32>
    %41 = vector.shape_cast %30 : vector<8x1xi32> to vector<8x1xi32>
    %42 = vector.broadcast %41 : vector<8x1xi32> to vector<8x128xi32>
    %43 = arith.select %37, %42, %22 : vector<8x128xi1>, vector<8x128xi32>
    %c1_i32 = arith.constant 1 : i32
    %cst_22 = arith.constant dense<0xFF800000> : vector<8xf32>
    %44 = vector.multi_reduction <maximumf>, %35, %cst_22 [1] : vector<8x256xf32> to vector<8xf32>
    %45 = vector.shape_cast %44 : vector<8xf32> to vector<8x1xf32>
    %46 = vector.broadcast %45 : vector<8x1xf32> to vector<8x256xf32>
    %47 = arith.cmpf oeq, %35, %46 : vector<8x256xf32>
    %48 = vector.broadcast %c2147483647_i32 : i32 to vector<8x256xi32>
    %49 = arith.select %47, %19, %48 : vector<8x256xi1>, vector<8x256xi32>
    %cst_23 = arith.constant dense<2147483647> : vector<8xi32>
    %50 = vector.multi_reduction <minsi>, %49, %cst_23 [1] : vector<8x256xi32> to vector<8xi32>
    %51 = vector.shape_cast %50 : vector<8xi32> to vector<8x1xi32>
    %52 = vector.broadcast %51 : vector<8x1xi32> to vector<8x256xi32>
    %53 = arith.cmpi eq, %19, %52 : vector<8x256xi32>
    %54 = arith.andi %47, %53 : vector<8x256xi1>
    %55 = vector.broadcast %cst_18 : f32 to vector<8x256xf32>
    %56 = arith.select %54, %55, %35 : vector<8x256xi1>, vector<8x256xf32>
    %57 = vector.broadcast %c1_i32 : i32 to vector<8x128xi32>
    %58 = arith.cmpi eq, %20, %57 : vector<8x128xi32>
    %59 = vector.shape_cast %45 : vector<8x1xf32> to vector<8x1xf32>
    %60 = vector.broadcast %59 : vector<8x1xf32> to vector<8x128xf32>
    %61 = arith.select %58, %60, %40 : vector<8x128xi1>, vector<8x128xf32>
    %62 = vector.shape_cast %51 : vector<8x1xi32> to vector<8x1xi32>
    %63 = vector.broadcast %62 : vector<8x1xi32> to vector<8x128xi32>
    %64 = arith.select %58, %63, %43 : vector<8x128xi1>, vector<8x128xi32>
    %c2_i32 = arith.constant 2 : i32
    %cst_24 = arith.constant dense<0xFF800000> : vector<8xf32>
    %65 = vector.multi_reduction <maximumf>, %56, %cst_24 [1] : vector<8x256xf32> to vector<8xf32>
    %66 = vector.shape_cast %65 : vector<8xf32> to vector<8x1xf32>
    %67 = vector.broadcast %66 : vector<8x1xf32> to vector<8x256xf32>
    %68 = arith.cmpf oeq, %56, %67 : vector<8x256xf32>
    %69 = vector.broadcast %c2147483647_i32 : i32 to vector<8x256xi32>
    %70 = arith.select %68, %19, %69 : vector<8x256xi1>, vector<8x256xi32>
    %cst_25 = arith.constant dense<2147483647> : vector<8xi32>
    %71 = vector.multi_reduction <minsi>, %70, %cst_25 [1] : vector<8x256xi32> to vector<8xi32>
    %72 = vector.shape_cast %71 : vector<8xi32> to vector<8x1xi32>
    %73 = vector.broadcast %72 : vector<8x1xi32> to vector<8x256xi32>
    %74 = arith.cmpi eq, %19, %73 : vector<8x256xi32>
    %75 = arith.andi %68, %74 : vector<8x256xi1>
    %76 = vector.broadcast %cst_18 : f32 to vector<8x256xf32>
    %77 = arith.select %75, %76, %56 : vector<8x256xi1>, vector<8x256xf32>
    %78 = vector.broadcast %c2_i32 : i32 to vector<8x128xi32>
    %79 = arith.cmpi eq, %20, %78 : vector<8x128xi32>
    %80 = vector.shape_cast %66 : vector<8x1xf32> to vector<8x1xf32>
    %81 = vector.broadcast %80 : vector<8x1xf32> to vector<8x128xf32>
    %82 = arith.select %79, %81, %61 : vector<8x128xi1>, vector<8x128xf32>
    %83 = vector.shape_cast %72 : vector<8x1xi32> to vector<8x1xi32>
    %84 = vector.broadcast %83 : vector<8x1xi32> to vector<8x128xi32>
    %85 = arith.select %79, %84, %64 : vector<8x128xi1>, vector<8x128xi32>
    %c3_i32 = arith.constant 3 : i32
    %cst_26 = arith.constant dense<0xFF800000> : vector<8xf32>
    %86 = vector.multi_reduction <maximumf>, %77, %cst_26 [1] : vector<8x256xf32> to vector<8xf32>
    %87 = vector.shape_cast %86 : vector<8xf32> to vector<8x1xf32>
    %88 = vector.broadcast %87 : vector<8x1xf32> to vector<8x256xf32>
    %89 = arith.cmpf oeq, %77, %88 : vector<8x256xf32>
    %90 = vector.broadcast %c2147483647_i32 : i32 to vector<8x256xi32>
    %91 = arith.select %89, %19, %90 : vector<8x256xi1>, vector<8x256xi32>
    %cst_27 = arith.constant dense<2147483647> : vector<8xi32>
    %92 = vector.multi_reduction <minsi>, %91, %cst_27 [1] : vector<8x256xi32> to vector<8xi32>
    %93 = vector.shape_cast %92 : vector<8xi32> to vector<8x1xi32>
    %94 = vector.broadcast %93 : vector<8x1xi32> to vector<8x256xi32>
    %95 = arith.cmpi eq, %19, %94 : vector<8x256xi32>
    %96 = arith.andi %89, %95 : vector<8x256xi1>
    %97 = vector.broadcast %cst_18 : f32 to vector<8x256xf32>
    %98 = arith.select %96, %97, %77 : vector<8x256xi1>, vector<8x256xf32>
    %99 = vector.broadcast %c3_i32 : i32 to vector<8x128xi32>
    %100 = arith.cmpi eq, %20, %99 : vector<8x128xi32>
    %101 = vector.shape_cast %87 : vector<8x1xf32> to vector<8x1xf32>
    %102 = vector.broadcast %101 : vector<8x1xf32> to vector<8x128xf32>
    %103 = arith.select %100, %102, %82 : vector<8x128xi1>, vector<8x128xf32>
    %104 = vector.shape_cast %93 : vector<8x1xi32> to vector<8x1xi32>
    %105 = vector.broadcast %104 : vector<8x1xi32> to vector<8x128xi32>
    %106 = arith.select %100, %105, %85 : vector<8x128xi1>, vector<8x128xi32>
    %c4_i32 = arith.constant 4 : i32
    %c0_28 = arith.constant 0 : index
    %c0_29 = arith.constant 0 : index
    %107 = vector.load %arg8[%c0_28, %c0_29] : memref<8x256xf32, #tpu.memory_space<vmem>>, vector<8x128xf32>
    tpu.vector_store %arg8[%c0_28, %c0_29], %103 {strides = array<i32>} : memref<8x256xf32, #tpu.memory_space<vmem>>, vector<8x128xf32>,
    %c0_30 = arith.constant 0 : index
    %c0_31 = arith.constant 0 : index
    %108 = vector.load %arg9[%c0_30, %c0_31] : memref<8x256xi32, #tpu.memory_space<vmem>>, vector<8x128xi32>
    tpu.vector_store %arg9[%c0_30, %c0_31], %106 {strides = array<i32>} : memref<8x256xi32, #tpu.memory_space<vmem>>, vector<8x128xi32>,
    %c1_i32_32 = arith.constant 1 : i32
    %109 = arith.cmpi eq, %arg1, %c1_i32_32 : i32
    %110 = arith.extui %109 : i1 to i32
    %c0_i32_33 = arith.constant 0 : i32
    %111 = arith.cmpi ne, %110, %c0_i32_33 : i32
    scf.if %111 {
      %c0_34 = arith.constant 0 : index
      %c0_35 = arith.constant 0 : index
      %112 = vector.load %arg6[%c0_34, %c0_35] : memref<8x128xf32, #tpu.memory_space<vmem>>, vector<8x128xf32>
      tpu.vector_store %arg6[%c0_34, %c0_35], %103 {strides = array<i32>} : memref<8x128xf32, #tpu.memory_space<vmem>>, vector<8x128xf32>,
      %c0_36 = arith.constant 0 : index
      %c0_37 = arith.constant 0 : index
      %113 = vector.load %arg7[%c0_36, %c0_37] : memref<8x128xi32, #tpu.memory_space<vmem>>, vector<8x128xi32>
      tpu.vector_store %arg7[%c0_36, %c0_37], %106 {strides = array<i32>} : memref<8x128xi32, #tpu.memory_space<vmem>>, vector<8x128xi32>,
    } else {
    }
    return
  }
  func.func @transform_0(%arg0: i32, %arg1: i32) -> (i32, i32) {
    %c0_i32 = arith.constant 0 : i32
    %c0_i32_0 = arith.constant 0 : i32
    return %arg0, %c0_i32 : i32, i32
  }
  func.func @transform_1(%arg0: i32, %arg1: i32) -> (i32, i32) {
    %c0_i32 = arith.constant 0 : i32
    %c0_i32_0 = arith.constant 0 : i32
    %c0_i32_1 = arith.constant 0 : i32
    return %c0_i32, %c0_i32_0 : i32, i32
  }
  func.func @transform_2(%arg0: i32, %arg1: i32) -> (i32, i32) {
    %c0_i32 = arith.constant 0 : i32
    %c0_i32_0 = arith.constant 0 : i32
    return %arg1, %c0_i32 : i32, i32
  }
  func.func @transform_3(%arg0: i32, %arg1: i32) -> (i32, i32) {
    %c0_i32 = arith.constant 0 : i32
    %c0_i32_0 = arith.constant 0 : i32
    return %c0_i32, %arg1 : i32, i32
  }
  func.func @transform_4(%arg0: i32, %arg1: i32) -> (i32, i32) {
    %c0_i32 = arith.constant 0 : i32
    %c0_i32_0 = arith.constant 0 : i32
    return %arg0, %c0_i32 : i32, i32
  }
  func.func @transform_5(%arg0: i32, %arg1: i32) -> (i32, i32) {
    %c0_i32 = arith.constant 0 : i32
    %c0_i32_0 = arith.constant 0 : i32
    return %arg0, %c0_i32 : i32, i32
  }
}

</mosaic_0001>

<bundles_post_ra>
// kernel: tpu_custom_call.1
= control target key start
LH: loop header
LB: loop body
LE: loop exit
PB: predicated region body
PF: predicated region fallthrough
CT: control target
= control target key end

     0   :  { %s1553_s0 = inlined_call_operand.hbm [shape: f32[16,128], index: 0, kind: input, shape index: {}]   ;;  %s1554_s1 = inlined_call_operand.vmem [shape: f32[1,128], index: 1, kind: input, shape index: {}]   ;;  %s1555_s2 = inlined_call_operand.hbm [shape: f32[256,128], index: 2, kind: input, shape index: {}]   ;;  %s1556_s3 = inlined_call_operand.vmem [shape: f32[1,256], index: 3, kind: input, shape index: {}]   ;;  %s1557_s4 = inlined_call_operand.hbm [shape: f32[16,128], index: 4, kind: output, shape index: {0}]   ;;  %s1558_s5 = inlined_call_operand.hbm [shape: s32[16,128], index: 5, kind: output, shape index: {1}]  }
   0x1   :  { %1571 = sst [smem:[#allocation21_spill]] %s1553_s0 }
   0x2   :  { %1572 = sst [smem:[#allocation22_spill]] %s1554_s1 }
   0x3   :  { %1573 = sst [smem:[#allocation23_spill]] %s1557_s4 }
   0x4   :  { %1574 = sst [smem:[#allocation24_spill]] %s1558_s5 }
   0x5   :  { %11 = vsyncpa [#allocation5], 0 }
   0x6   :  { %13 = vsyncpa [#allocation5 + $0x1], 0 }
   0x7   :  { %14 = vsyncpa [#allocation8], 0 }
   0x8   :  { %16 = vsyncpa [#allocation8 + $0x1], 0 }
   0x9   :  { %17 = vsyncpa [#allocation6], 0 }
   0xa   :  { %19 = vsyncpa [#allocation6 + $0x1], 0 }
   0xb   :  { %20 = vsyncpa [#allocation11], 0 }
   0xc   :  { %22 = vsyncpa [#allocation11 + $0x1], 0  ;;  %s1192_s18 = smov 0   ;;  %s1194_s19 = smov 0  }
   0xd   :  { %s1196_s20 = smov 0   ;;  %s1198_s21 = smov 0  }
   0xe   :  { %s1200_s22 = smov 0   ;;  %s1202_s23 = smov 0  }
   0xf   :  { %s1204_s24 = smov 0   ;;  %s1206_s25 = smov 0  }
  0x10   :  { %s1208_s26 = smov 0   ;;  %s1210_s27 = smov 0  }
  0x11   :  { %s1212_s28 = smov 0  }
  0x12 LB: > { %1575 = sst [smem:[#allocation16_spill]] %s1122_s21  ;;  %s744_s29 = sadd.s32 4294967295, %s1150_s28   ;;  %s1150_s28 = sphi %s1212_s28, %s1615_s28   ;;  %s1146_s27 = sphi %s1210_s27, %s1614_s27   ;;  %s1142_s26 = sphi %s1208_s26, %s1613_s26   ;;  %s1138_s25 = sphi %s1206_s25, %s1612_s25   ;;  %s1134_s24 = sphi %s1204_s24, %s1611_s24   ;;  %s1130_s23 = sphi %s1202_s23, %s1610_s23   ;;  %s1126_s22 = sphi %s1200_s22, %s1609_s22   ;;  %s1122_s21 = sphi %s1198_s21, %s1608_s21   ;;  %s1118_s20 = sphi %s1196_s20, %s1607_s20   ;;  %s1114_s19 = sphi %s1194_s19, %s1606_s19   ;;  %s1110_s18 = sphi %s1192_s18, %s1605_s18  }
  0x13   : > { %1576 = sst [smem:[#allocation17_spill]] %s1150_s28  ;;  %s745_s30 = sadd.s32 4294967294, %s1150_s28  }
  0x14   : > { %p54_p0 = scmp.ne.s32.totalorder %s1130_s23, %s1126_s22  ;;  %p55_p1 = scmp.eq.s32.totalorder %s1150_s28, 0 }
  0x15   : > { %p60_p2 = scmp.ne.s32.totalorder %s1126_s22, %s1122_s21  ;;  %p61_p3 = scmp.eq.s32.totalorder %s744_s29, 0 }
  0x16   : > { %p1254_p4 = por %p55_p1, %p54_p0  ;;  %p101_p5 = scmp.ne.s32.totalorder %s1118_s20, %s1114_s19 }
  0x17   : > { %p1260_p6 = por %p61_p3, %p60_p2  ;;  %p107_p7 = scmp.ne.s32.totalorder %s1114_s19, %s1110_s18 }
  0x18   : > { %p1265_p8 = por %p101_p5, %p55_p1  ;;  %p157_p9 = scmp.eq.s32.totalorder %s744_s29, 3 }
  0x19   : > { %p1269_p10 = por %p107_p7, %p61_p3  ;;  %p163_p11 = scmp.eq.s32.totalorder %s745_s30, 3 }
  0x1a   : > { %p1273_p12 = por %p157_p9, %p54_p0  ;;  %p844_p1 = scmp.lt.s32.totalorder %s1150_s28, 4 }
  0x1b   : > { %s1580_s11 = scalar_select %p1269_p10, 1, 0 }
  0x1c   : > { %s1581_s12 = scalar_select %p1273_p12, 1, 0 }
  0x1d   : > { %p1277_p13 = por %p163_p11, %p60_p2  ;;  %s212_s14 = sand.u32 1, %s1130_s23  }
  0x1e   : > { %1582 = sst [smem:[#allocation18_spill]] %s1581_s12  ;;  %s749_s15 = sshll.u32 %s1146_s27, 7 }
  0x1f   : > { %s1583_s13 = scalar_select %p1277_p13, 1, 0 }
  0x20   : > { %s748_s16 = sshll.u32 %s212_s14, 3  ;;  %s1585_s0 = sld [smem:[#allocation21_spill]] }
  0x21   : > { %1584 = sst [smem:[#allocation19_spill]] %s1583_s13  ;;  %s216_s7 = scalar_lea.vmem [#allocation4], %s748_s16 }
  0x22   : > { %s223_s6 = sshll.u32 %s216_s7, 4  ;;  %p1289_p3 = pnand %p844_p1, %p1254_p4  ;;  %s224_s6 = int_to_ptr.vmem [resolvable:$true] %s223_s6 }
  0x23   : > { %p1295_p0 = pnand %p844_p1, %p1265_p8  ;;  %p753_p2 = scmp.ge.s32.totalorder %s1150_s28, 1 }
  0x24   : > { %s213_s21 = scalar_lea.sflag [#allocation5], %s212_s14  ;;  %p942_p5 = pneg %p1289_p3 }
  0x25   : > { %s953_s17 = scalar_lea.vmem %s224_s6, 128  ;;  %s1152_s7 = smov [#allocation4]  }
  0x26   : > { %s221_s29 = scalar_lea.hbm %s1585_s0, %s749_s15  ;;  %p954_p7 = scmp.ne.s32.totalorder %s224_s6, %s953_s17 }
  0x27   : > { %s958_s8 = sshll.u32 %s1152_s7, 4  ;;  %s959_s8 = int_to_ptr.vmem [resolvable:$false] %s958_s8 }
  0x28   : > { %p956_p9 = pnand %p954_p7, %p942_p5  ;;  %s960_s15 = scalar_lea.vmem %s959_s8, 256 }
  0x29   : > { %p961_p4 = scmp.lt.s32.totalorder %s224_s6, %s959_s8  ;;  %p962_p13 = scmp.lt.s32.totalorder %s960_s15, %s953_s17 }
  0x2a   : > { %p957_p11 = pneg %p956_p9 }
  0x2b   : > { %p963_p12 = por %p962_p13, %p961_p4 }
  0x2d   : > { %p964_p10 = pnand %p963_p12, %p957_p11 }
  0x2f   : > { %967 = shalt.err (!%p964_p10)
}
  0x30   : > { %833 = dma.hbm_to_vmem [thread:$0]  (!%p1289_p3), %s221_s29, 128, %s224_s6, %s213_s21  }
  0x31   : > { %p255_p8 = scmp.lt.s32.totalorder %s1150_s28, 5  ;;  %s94_s10 = sadd.s32 1, %s1118_s20 }
  0x32   : > { %s37_s16 = sadd.s32 1, %s1142_s26  ;;  %s230_s18 = sand.u32 1, %s1118_s20  }
  0x33   : > { %p1308_p1 = pnand %p753_p2, %p255_p8  ;;  %p38_p10 = scmp.ge.s32.totalorder %s37_s16, 2 }
  0x34   : > { %s750_s30 = sshll.u32 %s230_s18, 7  ;;  %s769_s17 = sshll.u32 %s1142_s26, 11 }
  0x35   : > { %s1617_s16 = smov (%p38_p10, %s37_s16), 0  ;;  %s1590_s21 = sadd.s32 1, %s1146_s27 }
  0x36   : > { %1589 = sst [smem:[#allocation20_spill]] %s1617_s16  ;;  %s1619_s21 = smov (!%p38_p10, %s1590_s21), %s1146_s27 }
  0x37   : > { %s91_s6 = ssub.s32 %s1142_s26, %s1617_s16  ;;  %p42_p12 = scmp.ge.s32.totalorder %s1619_s21, 2 }
  0x38   : > { %p92_p13 = scmp.eq.s32.totalorder %s91_s6, 0  ;;  %s1325_s8 = scalar_lea.hbm %s1555_s2, %s769_s17 }
  0x39   : > { %s234_s15 = scalar_lea.vmem [#allocation7], %s750_s30  ;;  %s1621_s21 = smov (%p42_p12, %s1619_s21), 0 }
  0x3a   : > { %s241_s0 = sshll.u32 %s234_s15, 4  ;;  %s44_s5 = ssub.s32 %s1146_s27, %s1621_s21  ;;  %s242_s0 = int_to_ptr.vmem [resolvable:$true] %s241_s0 }
  0x3b   : > { %s1330_s28 = scalar_select %p92_p13, %s1118_s20, %s94_s10  }
  0x3c   : > { %p45_p3 = scmp.eq.s32.totalorder %s44_s5, 0  ;;  %s1591_s4 = sadd.s32 1, %s1130_s23 }
  0x3d   : > { %s231_s16 = scalar_lea.sflag [#allocation8], %s230_s18  ;;  %p970_p2 = pneg %p1295_p0 }
  0x3e   : > { %s1337_s12 = scalar_select %p45_p3, %s1130_s23, %s1591_s4  }
  0x3f   : > { %s981_s6 = scalar_lea.vmem %s242_s0, 2048  ;;  %s1153_s30 = smov [#allocation7]  }
  0x40   : > { %p982_p5 = scmp.ne.s32.totalorder %s242_s0, %s981_s6  ;;  %s986_s17 = sshll.u32 %s1153_s30, 4  ;;  %s987_s17 = int_to_ptr.vmem [resolvable:$false] %s986_s17 }
  0x41   : > { %s988_s29 = scalar_lea.vmem %s987_s17, 4096  ;;  %p989_p11 = scmp.lt.s32.totalorder %s242_s0, %s987_s17 }
  0x42   : > { %p984_p7 = pnand %p982_p5, %p970_p2  ;;  %p990_p4 = scmp.lt.s32.totalorder %s988_s29, %s981_s6 }
  0x44   : > { %p985_p9 = pneg %p984_p7  ;;  %p991_p8 = por %p990_p4, %p989_p11 }
  0x46   : > { %p992_p10 = pnand %p991_p8, %p985_p9 }
  0x48   : > { %995 = shalt.err (!%p992_p10)
}
  0x49   : > { %s1154_s5 = smov 128   ;;  %s1155_s4 = smov 8  }
  0x4a   : > { %836 = dma.hbm_to_vmem [thread:$0]  (!%p1295_p0), %s1325_s8, 2048, %s242_s0, %s231_s16, %s1154_s5, %s1154_s5, %s1155_s4  }
  0x4b   : > { %259 = sbr.rel (%p1308_p1) target bundleno = 2139 (0x85b), region = 36  ;;  %s1347_s10 = sand.u32 (!%p1308_p1), 1, %s1126_s22  }
  0x4c   : > { %s1350_s18 = sshll.u32 (!%p1308_p1), %s1347_s10, 3  ;;  %s262_s7 = scalar_lea.sflag (!%p1308_p1), [#allocation5], %s1347_s10 }
  0x4d   : > { %s265_s15 = scalar_lea.vmem (!%p1308_p1), [#allocation4], %s1350_s18 }
  0x50   : > { %1093 = dma.done.wait (%p1260_p6), %s262_s7, 128  }
  0x51   : > { %1095 = vsyncadd (%p1260_p6), %s262_s7, 4294967168  ;;  %s270_s0 = sand.u32 1, %s1114_s19   ;;  %p1592_p0 = scmp.ne.s32.totalorder %s1580_s11, 0 }
  0x52   : > { %s755_s13 = sshll.u32 %s270_s0, 7  ;;  %s271_s14 = scalar_lea.sflag [#allocation8], %s270_s0 }
  0x53   : > { %s1359_s16 = scalar_lea.vmem [#allocation7], %s755_s13 }
  0x54   : > { %1097 = dma.done.wait (%p1592_p0), %s271_s14, 2048  }
  0x55   : > { %1099 = vsyncadd (%p1592_p0), %s271_s14, 4294965248  ;;  %p315_p1 = scmp.lt.s32.totalorder %s1134_s24, 1  ;;  %s306_s17 = scalar_lea.vmem [#allocation9], %s1350_s18 }
  0x56   : > { %s1570_s29 = scalar_lea.vmem [#allocation10], %s1350_s18  ;;  %p758_p6 = scmp.ne.s32.totalorder %s1134_s24, 0 }
  0x57   : > { %s1367_s8 = scalar_select %p315_p1, %s1134_s24, 1 }
  0x58   : > { %321 = sbr.rel (%p758_p6) target bundleno = 95 (0x5f), region = 48 }
  0x59   : > { %s317_s30 = scalar_lea.vmem %s1556_s3, %s1367_s8 }
  0x5d   : > { %v1156_v0 = vmov -inf   ;;  %v1157_v1 = vmov 0  }
  0x5e   : > { %322 = vst [vmem:[#allocation2] sm:$0xff] %v1156_v0  ;;  %323 = vst [vmem:[#allocation3 + $0x8] sm:$0xff] %v1157_v1 }
  0x5f PF: > { %v348_v2 = vld [vmem:[%s1359_s16 + $0x78] sm:$0xff]  ;;  %v1158_v3 = vmov 0.0   ;;  %vm1159_vm0 = vmmov 0   ;;  %v347_v4 = vld [vmem:[%s1359_s16 + $0x70] sm:$0xff]  ;;  %v346_v5 = vld [vmem:[%s1359_s16 + $0x68] sm:$0xff]  ;;  %s1593_s1 = sld [smem:[#allocation22_spill]]  ;;  %v428_v22 = vlaneseq }
  0x60   : > { %787 = vmatprep.subr.mxu0 %v1158_v3  ;;  %819 = vmatprep.mubr.msk.f32.mxu0 %vm1159_vm0, %v1158_v3  ;;  %v345_v6 = vld [vmem:[%s1359_s16 + $0x60] sm:$0xff]  ;;  %v344_v7 = vld [vmem:[%s1359_s16 + $0x58] sm:$0xff]  ;;  %v343_v8 = vld [vmem:[%s1359_s16 + $0x50] sm:$0xff]  ;;  %s761_s4 = sshll.u32 %s1134_s24, 7  ;;  %p762_p12 = scmp.ne.s32.totalorder %s1134_s24, 1 }
  0x61   : > { %788 = vmatpush3.xpose.msra.mxu0 %v348_v2  ;;  %v342_v9 = vld [vmem:[%s1359_s16 + $0x48] sm:$0xff]  ;;  %v341_v10 = vld [vmem:[%s1359_s16 + $0x40] sm:$0xff]  ;;  %v340_v11 = vld [vmem:[%s1359_s16 + $0x38] sm:$0xff]  ;;  %v430_v23 = vstv %s761_s4  ;;  %v1398_v24 = vand.u32 127, %v428_v22 }
  0x62   : > { %789 = vmatprep.subr.mxu0 %v1158_v3  ;;  %v339_v12 = vld [vmem:[%s1359_s16 + $0x30] sm:$0xff]  ;;  %v338_v13 = vld [vmem:[%s1359_s16 + $0x28] sm:$0xff]  ;;  %v337_v14 = vld [vmem:[%s1359_s16 + $0x20] sm:$0xff] }
  0x63   : > { %v336_v15 = vld [vmem:[%s1359_s16 + $0x18] sm:$0xff]  ;;  %v335_v16 = vld [vmem:[%s1359_s16 + $0x10] sm:$0xff]  ;;  %v334_v17 = vld [vmem:[%s1359_s16 + $0x8] sm:$0xff]  ;;  %v1401_v25 = vadd.s32 %v430_v23, %v1398_v24  ;;  %vm466_vm13 = vcmp.eq.s32.totalorder %v1398_v24, 0  ;;  %vm498_vm14 = vcmp.eq.s32.totalorder %v1398_v24, 1 }
  0x64   : > { %v324_v18 = vld [vmem:[%s265_s15] sm:$0xff]  ;;  %v333_v20 = vld [vmem:[%s1359_s16] sm:$0xff] }
  0x65   : > { %790 = vmatpush3.xpose.msra.mxu0 %v347_v4  ;;  %v759_v19 = vld [vmem:[%s1593_s1] ss:$0 sm:$0xff]  ;;  %v1408_v32 = vld [vmem:[#allocation3 + $0x8] sm:$0xff] }
  0x66   : > { %791 = vmatprep.subr.mxu0 %v1158_v3  ;;  %v332_v21 = vsub.f32 %v324_v18, %v759_v19  ;;  %v760_v26 = vld [vmem:[%s317_s30] ss:$0 sm:$0xff] }
  0x67   : > { %v433_v28 = vld [vmem:[#allocation2] sm:$0xff] }
  0x69   : > { %792 = vmatpush3.xpose.msra.mxu0 %v346_v5 }
  0x6a   : > { %793 = vmatprep.subr.mxu0 %v1158_v3 }
  0x6d   : > { %794 = vmatpush3.xpose.msra.mxu0 %v345_v6 }
  0x6e   : > { %795 = vmatprep.subr.mxu0 %v1158_v3 }
  0x71   : > { %796 = vmatpush3.xpose.msra.mxu0 %v344_v7 }
  0x72   : > { %797 = vmatprep.subr.mxu0 %v1158_v3 }
  0x75   : > { %798 = vmatpush3.xpose.msra.mxu0 %v343_v8 }
  0x76   : > { %799 = vmatprep.subr.mxu0 %v1158_v3 }
  0x79   : > { %800 = vmatpush3.xpose.msra.mxu0 %v342_v9 }
  0x7a   : > { %801 = vmatprep.subr.mxu0 %v1158_v3 }
  0x7d   : > { %802 = vmatpush3.xpose.msra.mxu0 %v341_v10 }
  0x7e   : > { %803 = vmatprep.subr.mxu0 %v1158_v3 }
  0x81   : > { %804 = vmatpush3.xpose.msra.mxu0 %v340_v11 }
  0x82   : > { %805 = vmatprep.subr.mxu0 %v1158_v3 }
  0x85   : > { %806 = vmatpush3.xpose.msra.mxu0 %v339_v12 }
  0x86   : > { %807 = vmatprep.subr.mxu0 %v1158_v3 }
  0x89   : > { %808 = vmatpush3.xpose.msra.mxu0 %v338_v13 }
  0x8a   : > { %809 = vmatprep.subr.mxu0 %v1158_v3 }
  0x8d   : > { %810 = vmatpush3.xpose.msra.mxu0 %v337_v14 }
  0x8e   : > { %811 = vmatprep.subr.mxu0 %v1158_v3 }
  0x91   : > { %812 = vmatpush3.xpose.msra.mxu0 %v336_v15 }
  0x92   : > { %813 = vmatprep.subr.mxu0 %v1158_v3 }
  0x95   : > { %814 = vmatpush3.xpose.msra.mxu0 %v335_v16 }
  0x96   : > { %815 = vmatprep.subr.mxu0 %v1158_v3 }
  0x99   : > { %816 = vmatpush3.xpose.msra.mxu0 %v334_v17 }
  0x9a   : > { %817 = vmatprep.subr.mxu0 %v1158_v3 }
  0x9d   : > { %818 = vmatpush3.xpose.msra.mxu0 %v333_v20 }
  0xa0   : > { %820 = vmatmul.mubr.f32.vlgmr.msra.gmra.mxu0 %v332_v21 }
 0x160   : > { %v422_v27 = vpop.f32.mrf.mxu0 }
 0x161   : > { %v423_v29 = vadd.f32 %v760_v26, %v422_v27 }
 0x162   : > { %v821_v30 = vpop.f32.mrf.mxu0 }
 0x163   : > { %v437_v31 = vmax.f32 %v433_v28, %v423_v29 }
 0x165   : > { %438 = vmax.xlane.f32.xlu0 %v437_v31 }
 0x1ee   : > { %v1410_v33 = vpop.xlane.xlu0 %438 }
 0x1ef   : > { %vm440_vm1 = vcmp.eq.f32.partialorder %v433_v28, %v1410_v33  ;;  %vm441_vm2 = vcmp.eq.f32.partialorder %v423_v29, %v1410_v33 }
 0x1f0   : > { %v442_v34 = vsel %vm440_vm1, %v1408_v32, 2147483647  ;;  %v443_v35 = vsel %vm441_vm2, %v1401_v25, 2147483647 }
 0x1f1   : > { %vm444_vm3 = vcmp.lt.s32.totalorder %v442_v34, %v443_v35 }
 0x1f2   : > { %v445_v36 = vsel %vm444_vm3, %v442_v34, %v443_v35 }
 0x1f3   : > { %v447_v37 = vshra.s32 %v445_v36, 16  ;;  %v446_v39 = vand.u32 65535, %v445_v36 }
 0x1f5   : > { %v449_v38 = vcvt.s32.f32 %v447_v37  ;;  %v448_v41 = vcvt.s32.f32 %v446_v39 }
 0x1f7   : > { %450 = vmin.xlane.f32.xlu0 %v449_v38 }
 0x280   : > { %v451_v40 = vpop.xlane.xlu0 %450 }
 0x281   : > { %vm452_vm4 = vcmp.eq.f32.partialorder %v449_v38, %v451_v40  ;;  %v457_v43 = vcvt.f32.s32 %v451_v40 }
 0x282   : > { %v453_v42 = vsel %vm452_vm4, %v448_v41, inf }
 0x283   : > { %454 = vmin.xlane.f32.xlu1 %v453_v42  ;;  %v458_v45 = vshll.u32 %v457_v43, 16 }
 0x30c   : > { %v455_v44 = vpop.xlane.xlu1 %454 }
 0x30d   : > { %v456_v46 = vcvt.f32.s32 %v455_v44 }
 0x30f   : > { %v459_v47 = vadd.s32 %v458_v45, %v456_v46 }
 0x311   : > { %vm460_vm5 = vcmp.eq.s32.totalorder %v1408_v32, %v459_v47  ;;  %vm461_vm6 = vcmp.eq.s32.totalorder %v1401_v25, %v459_v47  ;;  %v468_v2 = vsel %vm466_vm13, %v459_v47, 0 }
 0x312   : > { %vm462_vm7 = vmand %vm440_vm1, %vm460_vm5 }
 0x313   : > { %vm463_vm8 = vmand %vm441_vm2, %vm461_vm6  ;;  %v464_v48 = vsel %vm462_vm7, -inf, %v433_v28  ;;  %vm530_vm7 = vcmp.eq.s32.totalorder %v1398_v24, 2  ;;  %v467_v28 = vsel %vm466_vm13, %v1410_v33, -inf }
 0x314   : > { %v465_v49 = vsel %vm463_vm8, -inf, %v423_v29 }
 0x315   : > { %v469_v50 = vmax.f32 %v464_v48, %v465_v49 }
 0x317   : > { %470 = vmax.xlane.f32.xlu1 %v469_v50 }
 0x3a0   : > { %v1426_v51 = vpop.xlane.xlu1 %470 }
 0x3a1   : > { %vm472_vm9 = vcmp.eq.f32.partialorder %v464_v48, %v1426_v51  ;;  %vm473_vm10 = vcmp.eq.f32.partialorder %v465_v49, %v1426_v51  ;;  %v499_v29 = vsel %vm498_vm14, %v1426_v51, %v467_v28 }
 0x3a2   : > { %v474_v52 = vsel %vm472_vm9, %v1408_v32, 2147483647  ;;  %v475_v53 = vsel %vm473_vm10, %v1401_v25, 2147483647 }
 0x3a3   : > { %vm476_vm11 = vcmp.lt.s32.totalorder %v474_v52, %v475_v53 }
 0x3a4   : > { %v477_v54 = vsel %vm476_vm11, %v474_v52, %v475_v53 }
 0x3a5   : > { %v479_v55 = vshra.s32 %v477_v54, 16  ;;  %v478_v57 = vand.u32 65535, %v477_v54 }
 0x3a7   : > { %v481_v56 = vcvt.s32.f32 %v479_v55  ;;  %v480_v59 = vcvt.s32.f32 %v478_v57 }
 0x3a9   : > { %482 = vmin.xlane.f32.xlu0 %v481_v56 }
 0x432   : > { %v483_v58 = vpop.xlane.xlu0 %482 }
 0x433   : > { %vm484_vm12 = vcmp.eq.f32.partialorder %v481_v56, %v483_v58  ;;  %v489_v61 = vcvt.f32.s32 %v483_v58 }
 0x434   : > { %v485_v60 = vsel %vm484_vm12, %v480_v59, inf  ;;  %vm556_vm12 = vcmp.eq.s32.totalorder %v1398_v24, 3 }
 0x435   : > { %486 = vmin.xlane.f32.xlu1 %v485_v60  ;;  %v490_v63 = vshll.u32 %v489_v61, 16 }
 0x4be   : > { %v487_v62 = vpop.xlane.xlu1 %486 }
 0x4bf   : > { %v488_v0 = vcvt.f32.s32 %v487_v62 }
 0x4c1   : > { %v491_v1 = vadd.s32 %v490_v63, %v488_v0 }
 0x4c3   : > { %v500_v3 = vsel %vm498_vm14, %v491_v1, %v468_v2  ;;  %vm492_vm15 = vcmp.eq.s32.totalorder %v1408_v32, %v491_v1  ;;  %vm493_vm0 = vcmp.eq.s32.totalorder %v1401_v25, %v491_v1 }
 0x4c4   : > { %vm494_vm1 = vmand %vm472_vm9, %vm492_vm15 }
 0x4c5   : > { %vm495_vm2 = vmand %vm473_vm10, %vm493_vm0  ;;  %v496_v4 = vsel %vm494_vm1, -inf, %v464_v48 }
 0x4c6   : > { %v497_v5 = vsel %vm495_vm2, -inf, %v465_v49 }
 0x4c7   : > { %v501_v6 = vmax.f32 %v496_v4, %v497_v5 }
 0x4c9   : > { %502 = vmax.xlane.f32.xlu0 %v501_v6 }
 0x552   : > { %v503_v7 = vpop.xlane.xlu0 %502 }
 0x553   : > { %vm504_vm3 = vcmp.eq.f32.partialorder %v496_v4, %v503_v7  ;;  %vm505_vm4 = vcmp.eq.f32.partialorder %v497_v5, %v503_v7  ;;  %v531_v30 = vsel %vm530_vm7, %v503_v7, %v499_v29 }
 0x554   : > { %v506_v8 = vsel %vm504_vm3, %v1408_v32, 2147483647  ;;  %v507_v9 = vsel %vm505_vm4, %v1401_v25, 2147483647 }
 0x555   : > { %vm508_vm5 = vcmp.lt.s32.totalorder %v506_v8, %v507_v9 }
 0x556   : > { %v509_v10 = vsel %vm508_vm5, %v506_v8, %v507_v9 }
 0x557   : > { %v511_v11 = vshra.s32 %v509_v10, 16  ;;  %v510_v13 = vand.u32 65535, %v509_v10 }
 0x559   : > { %v513_v12 = vcvt.s32.f32 %v511_v11  ;;  %v512_v15 = vcvt.s32.f32 %v510_v13 }
 0x55b   : > { %514 = vmin.xlane.f32.xlu1 %v513_v12 }
 0x5e4   : > { %v515_v14 = vpop.xlane.xlu1 %514 }
 0x5e5   : > { %vm516_vm6 = vcmp.eq.f32.partialorder %v513_v12, %v515_v14  ;;  %v521_v17 = vcvt.f32.s32 %v515_v14 }
 0x5e6   : > { %v517_v16 = vsel %vm516_vm6, %v512_v15, inf }
 0x5e7   : > { %518 = vmin.xlane.f32.xlu0 %v517_v16  ;;  %v522_v19 = vshll.u32 %v521_v17, 16 }
 0x670   : > { %v519_v18 = vpop.xlane.xlu0 %518 }
 0x671   : > { %v520_v20 = vcvt.f32.s32 %v519_v18 }
 0x673   : > { %v523_v21 = vadd.s32 %v522_v19, %v520_v20 }
 0x675   : > { %v532_v22 = vsel %vm530_vm7, %v523_v21, %v500_v3  ;;  %vm524_vm8 = vcmp.eq.s32.totalorder %v1408_v32, %v523_v21  ;;  %vm525_vm9 = vcmp.eq.s32.totalorder %v1401_v25, %v523_v21 }
 0x676   : > { %vm526_vm10 = vmand %vm504_vm3, %vm524_vm8 }
 0x677   : > { %vm527_vm11 = vmand %vm505_vm4, %vm525_vm9  ;;  %v528_v23 = vsel %vm526_vm10, -inf, %v496_v4 }
 0x678   : > { %v529_v26 = vsel %vm527_vm11, -inf, %v497_v5 }
 0x679   : > { %v533_v27 = vmax.f32 %v528_v23, %v529_v26 }
 0x67b   : > { %534 = vmax.xlane.f32.xlu1 %v533_v27 }
 0x704   : > { %v535_v31 = vpop.xlane.xlu1 %534 }
 0x705   : > { %vm536_vm15 = vcmp.eq.f32.partialorder %v528_v23, %v535_v31  ;;  %vm537_vm0 = vcmp.eq.f32.partialorder %v529_v26, %v535_v31  ;;  %v557_v34 = vsel %vm556_vm12, %v535_v31, %v531_v30 }
 0x706   : > { %v538_v35 = vsel %vm536_vm15, %v1408_v32, 2147483647  ;;  %v539_v36 = vsel %vm537_vm0, %v1401_v25, 2147483647  ;;  %559 = vst [vmem:[#allocation2] sm:$0xff] %v557_v34 }
 0x707   : > { %vm540_vm1 = vcmp.lt.s32.totalorder %v538_v35, %v539_v36 }
 0x708   : > { %v541_v33 = vsel %vm540_vm1, %v538_v35, %v539_v36 }
 0x709   : > { %v543_v37 = vshra.s32 %v541_v33, 16  ;;  %v542_v39 = vand.u32 65535, %v541_v33 }
 0x70b   : > { %v545_v38 = vcvt.s32.f32 %v543_v37  ;;  %v544_v41 = vcvt.s32.f32 %v542_v39 }
 0x70d   : > { %546 = vmin.xlane.f32.xlu0 %v545_v38 }
 0x796   : > { %v547_v40 = vpop.xlane.xlu0 %546 }
 0x797   : > { %vm548_vm13 = vcmp.eq.f32.partialorder %v545_v38, %v547_v40  ;;  %v553_v43 = vcvt.f32.s32 %v547_v40 }
 0x798   : > { %v549_v42 = vsel %vm548_vm13, %v544_v41, inf }
 0x799   : > { %550 = vmin.xlane.f32.xlu1 %v549_v42  ;;  %v554_v45 = vshll.u32 %v553_v43, 16 }
 0x822   : > { %v551_v44 = vpop.xlane.xlu1 %550 }
 0x823   : > { %v552_v46 = vcvt.f32.s32 %v551_v44 }
 0x824   : > { %564 = sbr.rel (%p762_p12) target bundleno = 2090 (0x82a), region = 52 }
 0x825   : > { %v555_v47 = vadd.s32 %v554_v45, %v552_v46 }
 0x827   : > { %v558_v25 = vsel %vm556_vm12, %v555_v47, %v532_v22 }
 0x828   : > { %560 = vst [vmem:[#allocation3 + $0x8] sm:$0xff] %v558_v25 }
 0x829   : > { %565 = vst [vmem:[%s306_s17] sm:$0xff] %v557_v34  ;;  %566 = vst [vmem:[%s1570_s29] sm:$0xff] %v558_v25 }
 0x82a PF: > { %s1594_s15 = sld [smem:[#allocation18_spill]]  ;;  %s765_s13 = sshll.u32 %s1138_s25, 7 }
 0x82b   : > { %s1595_s8 = sld [smem:[#allocation23_spill]]  ;;  %s586_s24 = sshll.u32 %s306_s17, 4  ;;  %s587_s24 = int_to_ptr.vmem [resolvable:$true] %s586_s24 }
 0x82c   : > { %s568_s6 = scalar_lea.sflag [#allocation6], %s1347_s10  ;;  %s996_s30 = scalar_lea.vmem %s587_s24, 128 }
 0x82d   : > { %p997_p13 = scmp.ne.s32.totalorder %s587_s24, %s996_s30  ;;  %s1160_s11 = smov [#allocation9]  }
 0x82e   : > { %s1000_s5 = sshll.u32 %s1160_s11, 4  ;;  %s1001_s5 = int_to_ptr.vmem [resolvable:$false] %s1000_s5 }
 0x82f   : > { %s1002_s4 = scalar_lea.vmem %s1001_s5, 256  ;;  %p1003_p7 = scmp.lt.s32.totalorder %s587_s24, %s1001_s5 }
 0x830   : > { %p1596_p3 = scmp.ne.s32.totalorder %s1594_s15, 0  ;;  %p1004_p9 = scmp.lt.s32.totalorder %s1002_s4, %s996_s30 }
 0x831   : > { %s584_s9 = scalar_lea.hbm %s1595_s8, %s765_s13 }
 0x832   : > { %p998_p2 = pnand %p997_p13, %p1596_p3  ;;  %p1005_p11 = por %p1004_p9, %p1003_p7 }
 0x834   : > { %p999_p5 = pneg %p998_p2 }
 0x836   : > { %p1006_p4 = pnand %p1005_p11, %p999_p5 }
 0x838   : > { %1009 = shalt.err (!%p1006_p4)
}
 0x839   : > { %s1010_s7 = scalar_lea.hbm %s584_s9, 128  ;;  %s1014_s14 = scalar_lea.hbm %s1595_s8, 256 }
 0x83a   : > { %p1011_p8 = scmp.ne.s32.totalorder %s584_s9, %s1010_s7  ;;  %p1015_p1 = scmp.lt.s32.totalorder %s584_s9, %s1595_s8 }
 0x83b   : > { %p1016_p6 = scmp.lt.s32.totalorder %s1014_s14, %s1010_s7 }
 0x83c   : > { %p1012_p10 = pnand %p1011_p8, %p1596_p3 }
 0x83d   : > { %p1017_p12 = por %p1016_p6, %p1015_p1 }
 0x83e   : > { %p1013_p0 = pneg %p1012_p10 }
 0x840   : > { %p1018_p13 = pnand %p1017_p12, %p1013_p0 }
 0x842   : > { %1021 = shalt.err (!%p1018_p13)
}
 0x843   : > { %826 = dma.vmem_to_hbm [thread:$0]  (%p1596_p3), %s587_s24, 128, %s584_s9, %s568_s6  }
 0x844   : > { %s1597_s5 = sld [smem:[#allocation24_spill]]  ;;  %s1598_s17 = scalar_lea.vmem [#allocation10], %s1350_s18 }
 0x845   : > { %s599_s0 = sshll.u32 %s1598_s17, 4  ;;  %s573_s29 = scalar_lea.sflag [#allocation11], %s1347_s10  ;;  %s600_s0 = int_to_ptr.vmem [resolvable:$true] %s599_s0 }
 0x846   : > { %s1022_s7 = scalar_lea.vmem %s600_s0, 128  ;;  %s1161_s14 = smov [#allocation10]  }
 0x847   : > { %p1023_p2 = scmp.ne.s32.totalorder %s600_s0, %s1022_s7  ;;  %s1026_s16 = sshll.u32 %s1161_s14, 4  ;;  %s1027_s16 = int_to_ptr.vmem [resolvable:$false] %s1026_s16 }
 0x848   : > { %s1028_s1 = scalar_lea.vmem %s1027_s16, 256  ;;  %p1029_p9 = scmp.lt.s32.totalorder %s600_s0, %s1027_s16 }
 0x849   : > { %p1024_p5 = pnand %p1023_p2, %p1596_p3  ;;  %p1030_p11 = scmp.lt.s32.totalorder %s1028_s1, %s1022_s7 }
 0x84a   : > { %s597_s4 = scalar_lea.hbm %s1597_s5, %s765_s13 }
 0x84b   : > { %p1025_p7 = pneg %p1024_p5  ;;  %p1031_p4 = por %p1030_p11, %p1029_p9 }
 0x84d   : > { %p1032_p8 = pnand %p1031_p4, %p1025_p7 }
 0x84f   : > { %1035 = shalt.err (!%p1032_p8)
}
 0x850   : > { %s1036_s25 = scalar_lea.hbm %s597_s4, 128  ;;  %s1040_s13 = scalar_lea.hbm %s1597_s5, 256 }
 0x851   : > { %p1037_p10 = scmp.ne.s32.totalorder %s597_s4, %s1036_s25  ;;  %p1041_p6 = scmp.lt.s32.totalorder %s597_s4, %s1597_s5 }
 0x852   : > { %p1042_p12 = scmp.lt.s32.totalorder %s1040_s13, %s1036_s25 }
 0x853   : > { %p1038_p0 = pnand %p1037_p10, %p1596_p3 }
 0x854   : > { %p1043_p13 = por %p1042_p12, %p1041_p6 }
 0x855   : > { %p1039_p1 = pneg %p1038_p0 }
 0x857   : > { %p1044_p2 = pnand %p1043_p13, %p1039_p1 }
 0x859   : > { %1047 = shalt.err (!%p1044_p2)
}
 0x85a   : > { %827 = dma.vmem_to_hbm [thread:$0]  (%p1596_p3), %s600_s0, 128, %s597_s4, %s573_s29  }
 0x85b PF: > { %s1599_s1 = sld [smem:[#allocation17_spill]] }
 0x85c   : > { %s1600_s6 = sld [smem:[#allocation16_spill]] }
 0x85d   : > { %s1601_s30 = sld [smem:[#allocation19_spill]] }
 0x861   : > { %p845_p5 = scmp.ge.s32.totalorder %s1599_s1, 2 }
 0x862   : > { %s611_s11 = sand.u32 1, %s1600_s6  }
 0x863   : > { %p1602_p7 = scmp.ne.s32.totalorder %s1601_s30, 0  ;;  %s612_s17 = scalar_lea.sflag [#allocation6], %s611_s11 }
 0x865   : > { %p838_p9 = pnand %p845_p5, %p1602_p7 }
 0x867   : > { %p839_p11 = pneg %p838_p9 }
 0x869   : > { %1101 = dma.done.wait (%p839_p11), %s612_s17, 128  }
 0x86a   : > { %1103 = vsyncadd (%p839_p11), %s612_s17, 4294967168  ;;  %s621_s7 = scalar_lea.sflag [#allocation11], %s611_s11 }
 0x86b   : > { %1105 = dma.done.wait (%p839_p11), %s621_s7, 128  }
 0x86c   : > { %1107 = vsyncadd (%p839_p11), %s621_s7, 4294967168  ;;  %s28_s14 = sadd.s32 1, %s1599_s1   ;;  %s1603_s15 = sld [smem:[#allocation20_spill]] }
 0x86d   : > { %p25_p4 = scmp.ge.s32.totalorder %s28_s14, 6   ;;  %s1604_s4 = smov %s1621_s21 }
 0x86e   : > { %s1605_s18 = smov %s1114_s19  ;;  %s1606_s19 = smov %s1118_s20 }
 0x86f   : > { %s1607_s20 = smov %s1330_s28  ;;  %s1608_s21 = smov %s1126_s22 }
 0x870   : > { %s1609_s22 = smov %s1130_s23  ;;  %s1610_s23 = smov %s1337_s12 }
 0x871   : > { %s1611_s24 = smov %s1142_s26  ;;  %s1612_s25 = smov %s1146_s27 }
 0x872   : > { %s1613_s26 = smov %s1603_s15  ;;  %s1614_s27 = smov %s1604_s4 }
 0x873   : > { %s1615_s28 = smov %s28_s14  ;;  %27 = sbr.rel (!%p25_p4) target bundleno = 18 (0x12), region = 122 }
 0x878   :  { %626 = vsyncpa [#allocation5], 1 }
 0x879   :  { %628 = vsyncpa [#allocation5 + $0x1], 1 }
 0x87a   :  { %629 = vsyncpa [#allocation8], 1 }
 0x87b   :  { %631 = vsyncpa [#allocation8 + $0x1], 1 }
 0x87c   :  { %632 = vsyncpa [#allocation6], 1 }
 0x87d   :  { %634 = vsyncpa [#allocation6 + $0x1], 1 }
 0x87e   :  { %635 = vsyncpa [#allocation11], 1 }
 0x87f   :  { %637 = vsyncpa [#allocation11 + $0x1], 1 }

</bundles_post_ra>
